<compile_context>
chip_gen: v6e
topology: v6e:2x2x1
jax: 0.10.0
libtpu: 0.0.40
codegen_flags: <defaults>
</compile_context>

<pallas_src>
import functools
import math

import jax
import jax.numpy as jnp
import numpy as np
from jax import lax
from jax.experimental import pallas as pl
from jax.experimental.pallas import tpu as pltpu

# ---- defaults from HardNegtive_loss.__init__ (alpha is unused in forward) ----
TAU_PLUS = 0.1
BETA = 1.0
TEMPERATURE = 0.5
ESTIMATOR = "hard"
NORMALIZE = True
EPS = 1e-12  # F.normalize default eps
# TODO(synk): alpha and .cuda() placement from the PyTorch module have no role in
# the forward math; they are intentionally not translated.


# ------------------------------- Pallas kernel --------------------------------
def _hcl_kernel(x1a_ref, x2a_ref, y1_ref, y2_ref, out_ref, acc_ref, *,
                batch_size, padded_batch, tau_plus, beta, temperature,
                estimator, normalize, use_bf16):
    """Grid = (row_tiles, col_tiles); the column axis is the reduction axis.

    x1a_ref, x2a_ref : (TM, C) anchor row tiles of out_1 / out_2   (index i)
    y1_ref,  y2_ref  : (TN, C) column tiles of out_1 / out_2       (index j)
    out_ref          : (TM, 2) per-row losses (col 0: out_1 anchors, col 1: out_2)
    acc_ref          : (TM, 8) VMEM row-sum accumulators
    """
    j = pl.program_id(1)
    hard = estimator == "hard"
    inv_t = 1.0 / temperature
    scale = math.sqrt(inv_t)                 # fold 1/T into operands: no extra
                                             # VALU pass over the (TM,TN) tile
    n_neg = float(2 * batch_size - 2)        # N in the reference
    n_pad = float(2 * (padded_batch - batch_size))  # zero-padded cols -> exp(0)=1
    mxu_dtype = jnp.bfloat16 if use_bf16 else jnp.float32

    def prep(ref):
        v = ref[...].astype(jnp.float32)
        if normalize:
            sq = jnp.sum(v * v, axis=1, keepdims=True)
            # 1/max(||v||,eps) == rsqrt(max(||v||^2, eps^2)); fold in sqrt(1/T).
            v = v * (lax.rsqrt(jnp.maximum(sq, EPS * EPS)) * scale)
        elif scale != 1.0:
            v = v * scale
        return v.astype(mxu_dtype)

    x1, x2 = prep(x1a_ref), prep(x2a_ref)    # anchors (fixed along j)
    y1, y2 = prep(y1_ref), prep(y2_ref)      # streaming column tiles

    @pl.when(j == 0)
    def _init():
        acc_ref[...] = jnp.zeros_like(acc_ref)

    def tile_sums(xa, yc):
        # (TM, TN) tile of exp(sim / T); bf16 operands, f32 accumulation on MXU.
        s = lax.dot_general(xa, yc, (((1,), (1,)), ((), ())),
                            preferred_element_type=jnp.float32)
        n = jnp.exp(s)
        rs_n = jnp.sum(n, axis=1, keepdims=True)
        if not hard:
            return rs_n, None, None
        if beta == 1.0:                      # imp == neg -> reuse, no 2nd exp
            return rs_n, jnp.sum(n * n, axis=1, keepdims=True), None
        if beta == 2.0:                      # small-integer beta: VALU powers
            nn = n * n
            return (rs_n, jnp.sum(nn * n, axis=1, keepdims=True),
                    jnp.sum(nn, axis=1, keepdims=True))
        imp = jnp.exp(beta * s)              # general beta
        return (rs_n, jnp.sum(imp * n, axis=1, keepdims=True),
                jnp.sum(imp, axis=1, keepdims=True))

    # 2x2 view-block structure of the Gram matrix; accumulate per-anchor-row sums.
    for view, xa in ((0, x1), (1, x2)):
        acc_n = acc_impn = acc_imp = None
        for yc in (y1, y2):
            rn, rin, ri = tile_sums(xa, yc)
            acc_n = rn if acc_n is None else acc_n + rn
            if rin is not None:
                acc_impn = rin if acc_impn is None else acc_impn + rin
            if ri is not None:
                acc_imp = ri if acc_imp is None else acc_imp + ri
        acc_ref[:, view:view + 1] += acc_n
        if acc_impn is not None:
            acc_ref[:, 2 + view:3 + view] += acc_impn
        if acc_imp is not None:
            acc_ref[:, 4 + view:5 + view] += acc_imp

    @pl.when(j == pl.num_programs(1) - 1)
    def _finalize():
        # Positive similarity computed directly from the anchor tiles; per-row
        # self-similarity corrections computed from the same operands that fed
        # the MXU (NOT hard-coded exp(1/T)).  sqrt(1/T) is already folded in.
        x1f, x2f = x1.astype(jnp.float32), x2.astype(jnp.float32)
        pos = jnp.exp(jnp.sum(x1f * x2f, axis=1, keepdims=True))
        self1 = jnp.exp(jnp.sum(x1f * x1f, axis=1, keepdims=True))
        self2 = jnp.exp(jnp.sum(x2f * x2f, axis=1, keepdims=True))

        def powb(t):                         # t ** beta (beta is static)
            if beta == 1.0:
                return t
            if beta == 2.0:
                return t * t
            return jnp.exp(beta * jnp.log(t))

        clamp_min = n_neg * math.exp(-1.0 / temperature)
        for view, self_v in ((0, self1), (1, self2)):
            sum_n = acc_ref[:, view:view + 1]
            if hard:
                sum_impn = acc_ref[:, 2 + view:3 + view]
                sum_imp = sum_n if beta == 1.0 else acc_ref[:, 4 + view:5 + view]
                # exclude self column, positive-pair column and zero-padded cols
                m_impn = sum_impn - powb(self_v) * self_v - powb(pos) * pos - n_pad
                m_imp = sum_imp - powb(self_v) - powb(pos) - n_pad
                # reweight = sum(imp*neg)/mean(imp) = sum(imp*neg) * N / sum(imp)
                reweight = m_impn * n_neg * pl.reciprocal(m_imp, approx=True)
                ng = (-tau_plus * n_neg * pos + reweight) / (1.0 - tau_plus)
                ng = jnp.maximum(ng, clamp_min)
            else:                            # 'easy'
                ng = sum_n - self_v - pos - n_pad
            # TODO(synk): like the PyTorch reference, exp(sim/T) can overflow when
            # normalize=False with large-magnitude embeddings (no LSE stabilization).
            out_ref[:, view:view + 1] = -jnp.log(pos / (pos + ng))


# ------------------------------- host wrapper ----------------------------------
def _round_up(x, m):
    return ((x + m - 1) // m) * m


@functools.partial(jax.jit, static_argnames=(
    "tau_plus", "beta", "temperature", "estimator", "normalize",
    "use_bf16", "tile"))
def hard_negative_loss(out_1, out_2, tau_plus=TAU_PLUS, beta=BETA,
                       temperature=TEMPERATURE, estimator=ESTIMATOR,
                       normalize=NORMALIZE, use_bf16=True, tile=None):
    if estimator not in ("hard", "easy"):
        raise ValueError("Invalid estimator selected. Please use any of [hard, easy]")
    B, C = out_1.shape
    if tile is None:
        # 256 matches the v6e/v7x MXU; small batches use a single full-size tile.
        tile = 256 if B >= 256 else _round_up(B, 8)
    tile = max(8, _round_up(tile, 8))
    Bp = _round_up(B, tile)
    if Bp != B:  # zero-pad; padded rows/columns are corrected for in the kernel
        out_1 = jnp.pad(out_1, ((0, Bp - B), (0, 0)))
        out_2 = jnp.pad(out_2, ((0, Bp - B), (0, 0)))

    kernel = functools.partial(
        _hcl_kernel, batch_size=B, padded_batch=Bp, tau_plus=float(tau_plus),
        beta=float(beta), temperature=float(temperature), estimator=estimator,
        normalize=bool(normalize), use_bf16=bool(use_bf16))

    anchor_spec = pl.BlockSpec((tile, C), lambda i, j: (i, 0))   # fixed along j
    column_spec = pl.BlockSpec((tile, C), lambda i, j: (j, 0))   # streams along j

    losses = pl.pallas_call(
        kernel,
        out_shape=jax.ShapeDtypeStruct((Bp, 2), jnp.float32),
        grid=(Bp // tile, Bp // tile),
        in_specs=[anchor_spec, anchor_spec, column_spec, column_spec],
        out_specs=pl.BlockSpec((tile, 2), lambda i, j: (i, 0)),
        scratch_shapes=[pltpu.VMEM((tile, 8), jnp.float32)],
        compiler_params=pltpu.CompilerParams(
            # row tiles split across TensorCores (v7x megacore); columns are the
            # sequential reduction axis with accumulator scratch.
            dimension_semantics=("parallel", "arbitrary"),
            vmem_limit_bytes=48 * 1024 * 1024),
    )(out_1, out_2, out_1, out_2)

    # col 0: losses for out_1 anchors, col 1: out_2 anchors (rows >= B are padding).
    return jnp.mean(losses[:B, :])


# ------------------- numpy reference (mirrors the PyTorch code) ----------------
def _get_negative_mask(batch_size):
    m = np.ones((batch_size, 2 * batch_size), dtype=bool)
    for i in range(batch_size):
        m[i, i] = False
        m[i, i + batch_size] = False
    return np.concatenate([m, m], axis=0)


def _loss_ref(out_1, out_2, tau_plus=TAU_PLUS, beta=BETA, temperature=TEMPERATURE,
              estimator=ESTIMATOR, normalize=NORMALIZE):
    out_1 = np.asarray(out_1, np.float64)
    out_2 = np.asarray(out_2, np.float64)
    if normalize:
        out_1 = out_1 / np.maximum(np.linalg.norm(out_1, axis=1, keepdims=True), EPS)
        out_2 = out_2 / np.maximum(np.linalg.norm(out_2, axis=1, keepdims=True), EPS)
    B = out_1.shape[0]
    out = np.concatenate([out_1, out_2], axis=0)
    neg = np.exp(out @ out.T / temperature)
    mask = _get_negative_mask(B)
    neg_sel = neg[mask].reshape(2 * B, -1)
    pos = np.exp(np.sum(out_1 * out_2, axis=-1) / temperature)
    pos = np.concatenate([pos, pos], axis=0)
    N = B * 2 - 2
    if estimator == "hard":
        imp = np.exp(beta * np.log(neg_sel))
        reweight_neg = (imp * neg_sel).sum(axis=-1) / imp.mean(axis=-1)
        Ng = (-tau_plus * N * pos + reweight_neg) / (1 - tau_plus)
        Ng = np.maximum(Ng, N * np.e ** (-1 / temperature))
    else:
        Ng = neg_sel.sum(axis=-1)
    return float(np.mean(-np.log(pos / (pos + Ng))))


# ------------------------------------ main --------------------------------------
def _check(B, C, key, rtol, **kw):
    k1, k2 = jax.random.split(key)
    a = jax.random.normal(k1, (B, C), jnp.float32)
    b = a + 0.1 * jax.random.normal(k2, (B, C), jnp.float32)
    got = float(jax.block_until_ready(hard_negative_loss(a, b, **kw)))
    ref_kw = {k: v for k, v in kw.items()
              if k in ("tau_plus", "beta", "temperature", "estimator", "normalize")}
    want = _loss_ref(np.asarray(a), np.asarray(b), **ref_kw)
    np.testing.assert_allclose(got, want, rtol=rtol, atol=1e-3)


if __name__ == "__main__":
    root = jax.random.PRNGKey(0)
    keys = jax.random.split(root, 6)

    # hard estimator, beta=1, bf16 MXU (default config)
    _check(8, 32, keys[0], rtol=4e-2)
    # same math with f32 matmul -> tight check of the correction algebra
    _check(8, 32, keys[1], rtol=5e-3, use_bf16=False)
    # easy estimator
    _check(8, 32, keys[2], rtol=4e-2, estimator="easy")
    # integer beta fast path (imp = neg**2, no second exp)
    _check(8, 32, keys[3], rtol=4e-2, beta=2.0)
    # multi-tile grid (2x2) with zero-padded rows/columns, bf16 and f32
    _check(12, 32, keys[4], rtol=4e-2, tile=8)
    _check(12, 32, keys[5], rtol=5e-3, tile=8, use_bf16=False)

    print("KERNEL_OK")
</pallas_src>

<mosaic_0001>
module attributes {stable_mosaic.version = 11 : i64} {
  func.func @_hcl_kernel(%arg0: i32, %arg1: i32, %arg2: memref<8x32xf32, #tpu.memory_space<vmem>>, %arg3: memref<8x32xf32, #tpu.memory_space<vmem>>, %arg4: memref<8x32xf32, #tpu.memory_space<vmem>>, %arg5: memref<8x32xf32, #tpu.memory_space<vmem>>, %arg6: memref<8x2xf32, #tpu.memory_space<vmem>>, %arg7: memref<8x8xf32, #tpu.memory_space<vmem>>) attributes {dimension_semantics = [#tpu.dimension_semantics<parallel>, #tpu.dimension_semantics<arbitrary>], iteration_bounds = array<i64: 1, 1>, scalar_prefetch = 0 : i64, scratch_operands = 1 : i64, tpu.core_type = #tpu.core_type<tc>, window_params = [{transform_indices = @transform_0, window_bounds = array<i64: 8, 32>}, {transform_indices = @transform_1, window_bounds = array<i64: 8, 32>}, {transform_indices = @transform_2, window_bounds = array<i64: 8, 32>}, {transform_indices = @transform_3, window_bounds = array<i64: 8, 32>}, {transform_indices = @transform_4, window_bounds = array<i64: 8, 2>}]} {
    %c0 = arith.constant 0 : index
    %c0_0 = arith.constant 0 : index
    %0 = vector.load %arg2[%c0, %c0_0] : memref<8x32xf32, #tpu.memory_space<vmem>>, vector<8x32xf32>
    %1 = arith.mulf %0, %0 : vector<8x32xf32>
    %cst = arith.constant dense<0.000000e+00> : vector<8xf32>
    %2 = vector.multi_reduction <add>, %1, %cst [1] : vector<8x32xf32> to vector<8xf32>
    %3 = vector.shape_cast %2 : vector<8xf32> to vector<8x1xf32>
    %cst_1 = arith.constant 1.000000e-24 : f32
    %4 = vector.broadcast %cst_1 : f32 to vector<8x1xf32>
    %5 = arith.maximumf %3, %4 : vector<8x1xf32>
    %6 = math.rsqrt %5 : vector<8x1xf32>
    %cst_2 = arith.constant 1.41421354 : f32
    %7 = vector.broadcast %cst_2 : f32 to vector<8x1xf32>
    %8 = arith.mulf %6, %7 : vector<8x1xf32>
    %9 = vector.broadcast %8 : vector<8x1xf32> to vector<8x32xf32>
    %10 = arith.mulf %0, %9 : vector<8x32xf32>
    %11 = arith.truncf %10 : vector<8x32xf32> to vector<8x32xbf16>
    %c0_3 = arith.constant 0 : index
    %c0_4 = arith.constant 0 : index
    %12 = vector.load %arg3[%c0_3, %c0_4] : memref<8x32xf32, #tpu.memory_space<vmem>>, vector<8x32xf32>
    %13 = arith.mulf %12, %12 : vector<8x32xf32>
    %cst_5 = arith.constant dense<0.000000e+00> : vector<8xf32>
    %14 = vector.multi_reduction <add>, %13, %cst_5 [1] : vector<8x32xf32> to vector<8xf32>
    %15 = vector.shape_cast %14 : vector<8xf32> to vector<8x1xf32>
    %cst_6 = arith.constant 1.000000e-24 : f32
    %16 = vector.broadcast %cst_6 : f32 to vector<8x1xf32>
    %17 = arith.maximumf %15, %16 : vector<8x1xf32>
    %18 = math.rsqrt %17 : vector<8x1xf32>
    %cst_7 = arith.constant 1.41421354 : f32
    %19 = vector.broadcast %cst_7 : f32 to vector<8x1xf32>
    %20 = arith.mulf %18, %19 : vector<8x1xf32>
    %21 = vector.broadcast %20 : vector<8x1xf32> to vector<8x32xf32>
    %22 = arith.mulf %12, %21 : vector<8x32xf32>
    %23 = arith.truncf %22 : vector<8x32xf32> to vector<8x32xbf16>
    %c0_8 = arith.constant 0 : index
    %c0_9 = arith.constant 0 : index
    %24 = vector.load %arg4[%c0_8, %c0_9] : memref<8x32xf32, #tpu.memory_space<vmem>>, vector<8x32xf32>
    %25 = arith.mulf %24, %24 : vector<8x32xf32>
    %cst_10 = arith.constant dense<0.000000e+00> : vector<8xf32>
    %26 = vector.multi_reduction <add>, %25, %cst_10 [1] : vector<8x32xf32> to vector<8xf32>
    %27 = vector.shape_cast %26 : vector<8xf32> to vector<8x1xf32>
    %cst_11 = arith.constant 1.000000e-24 : f32
    %28 = vector.broadcast %cst_11 : f32 to vector<8x1xf32>
    %29 = arith.maximumf %27, %28 : vector<8x1xf32>
    %30 = math.rsqrt %29 : vector<8x1xf32>
    %cst_12 = arith.constant 1.41421354 : f32
    %31 = vector.broadcast %cst_12 : f32 to vector<8x1xf32>
    %32 = arith.mulf %30, %31 : vector<8x1xf32>
    %33 = vector.broadcast %32 : vector<8x1xf32> to vector<8x32xf32>
    %34 = arith.mulf %24, %33 : vector<8x32xf32>
    %35 = arith.truncf %34 : vector<8x32xf32> to vector<8x32xbf16>
    %c0_13 = arith.constant 0 : index
    %c0_14 = arith.constant 0 : index
    %36 = vector.load %arg5[%c0_13, %c0_14] : memref<8x32xf32, #tpu.memory_space<vmem>>, vector<8x32xf32>
    %37 = arith.mulf %36, %36 : vector<8x32xf32>
    %cst_15 = arith.constant dense<0.000000e+00> : vector<8xf32>
    %38 = vector.multi_reduction <add>, %37, %cst_15 [1] : vector<8x32xf32> to vector<8xf32>
    %39 = vector.shape_cast %38 : vector<8xf32> to vector<8x1xf32>
    %cst_16 = arith.constant 1.000000e-24 : f32
    %40 = vector.broadcast %cst_16 : f32 to vector<8x1xf32>
    %41 = arith.maximumf %39, %40 : vector<8x1xf32>
    %42 = math.rsqrt %41 : vector<8x1xf32>
    %cst_17 = arith.constant 1.41421354 : f32
    %43 = vector.broadcast %cst_17 : f32 to vector<8x1xf32>
    %44 = arith.mulf %42, %43 : vector<8x1xf32>
    %45 = vector.broadcast %44 : vector<8x1xf32> to vector<8x32xf32>
    %46 = arith.mulf %36, %45 : vector<8x32xf32>
    %47 = arith.truncf %46 : vector<8x32xf32> to vector<8x32xbf16>
    %c0_i32 = arith.constant 0 : i32
    %48 = arith.cmpi eq, %arg1, %c0_i32 : i32
    %49 = arith.extui %48 : i1 to i32
    %c0_i32_18 = arith.constant 0 : i32
    %50 = arith.cmpi ne, %49, %c0_i32_18 : i32
    scf.if %50 {
      %cst_46 = arith.constant 0.000000e+00 : f32
      %98 = vector.broadcast %cst_46 : f32 to vector<8x8xf32>
      %c0_47 = arith.constant 0 : index
      %c0_48 = arith.constant 0 : index
      %99 = vector.load %arg7[%c0_47, %c0_48] : memref<8x8xf32, #tpu.memory_space<vmem>>, vector<8x8xf32>
      tpu.vector_store %arg7[%c0_47, %c0_48], %98 {strides = array<i32>} : memref<8x8xf32, #tpu.memory_space<vmem>>, vector<8x8xf32>,
    } else {
    }
    %cst_19 = arith.constant dense<0.000000e+00> : vector<8x8xf32>
    %51 = tpu.matmul %11, %35, %cst_19 {dimension_numbers = #tpu.dot_dimension_numbers<[1], [1], [0], [0], [0, 0, 1, 0], [], []>} : vector<8x32xbf16>, vector<8x32xbf16>, vector<8x8xf32> -> vector<8x8xf32>
    %52 = math.exp %51 : vector<8x8xf32>
    %cst_20 = arith.constant dense<0.000000e+00> : vector<8xf32>
    %53 = vector.multi_reduction <add>, %52, %cst_20 [1] : vector<8x8xf32> to vector<8xf32>
    %54 = vector.shape_cast %53 : vector<8xf32> to vector<8x1xf32>
    %55 = arith.mulf %52, %52 : vector<8x8xf32>
    %cst_21 = arith.constant dense<0.000000e+00> : vector<8xf32>
    %56 = vector.multi_reduction <add>, %55, %cst_21 [1] : vector<8x8xf32> to vector<8xf32>
    %57 = vector.shape_cast %56 : vector<8xf32> to vector<8x1xf32>
    %cst_22 = arith.constant dense<0.000000e+00> : vector<8x8xf32>
    %58 = tpu.matmul %11, %47, %cst_22 {dimension_numbers = #tpu.dot_dimension_numbers<[1], [1], [0], [0], [0, 0, 1, 0], [], []>} : vector<8x32xbf16>, vector<8x32xbf16>, vector<8x8xf32> -> vector<8x8xf32>
    %59 = math.exp %58 : vector<8x8xf32>
    %cst_23 = arith.constant dense<0.000000e+00> : vector<8xf32>
    %60 = vector.multi_reduction <add>, %59, %cst_23 [1] : vector<8x8xf32> to vector<8xf32>
    %61 = vector.shape_cast %60 : vector<8xf32> to vector<8x1xf32>
    %62 = arith.mulf %59, %59 : vector<8x8xf32>
    %cst_24 = arith.constant dense<0.000000e+00> : vector<8xf32>
    %63 = vector.multi_reduction <add>, %62, %cst_24 [1] : vector<8x8xf32> to vector<8xf32>
    %64 = vector.shape_cast %63 : vector<8xf32> to vector<8x1xf32>
    %65 = arith.addf %54, %61 : vector<8x1xf32>
    %66 = arith.addf %57, %64 : vector<8x1xf32>
    %c0_25 = arith.constant 0 : index
    %c0_26 = arith.constant 0 : index
    %67 = vector.load %arg7[%c0_25, %c0_26] : memref<8x8xf32, #tpu.memory_space<vmem>>, vector<8x1xf32>
    %68 = arith.addf %67, %65 : vector<8x1xf32>
    %c0_27 = arith.constant 0 : index
    %c0_28 = arith.constant 0 : index
    %69 = vector.load %arg7[%c0_27, %c0_28] : memref<8x8xf32, #tpu.memory_space<vmem>>, vector<8x1xf32>
    tpu.vector_store %arg7[%c0_27, %c0_28], %68 {strides = array<i32>} : memref<8x8xf32, #tpu.memory_space<vmem>>, vector<8x1xf32>,
    %c0_29 = arith.constant 0 : index
    %c2 = arith.constant 2 : index
    %70 = vector.load %arg7[%c0_29, %c2] : memref<8x8xf32, #tpu.memory_space<vmem>>, vector<8x1xf32>
    %71 = arith.addf %70, %66 : vector<8x1xf32>
    %c0_30 = arith.constant 0 : index
    %c2_31 = arith.constant 2 : index
    %72 = vector.load %arg7[%c0_30, %c2_31] : memref<8x8xf32, #tpu.memory_space<vmem>>, vector<8x1xf32>
    tpu.vector_store %arg7[%c0_30, %c2_31], %71 {strides = array<i32>} : memref<8x8xf32, #tpu.memory_space<vmem>>, vector<8x1xf32>,
    %cst_32 = arith.constant dense<0.000000e+00> : vector<8x8xf32>
    %73 = tpu.matmul %23, %35, %cst_32 {dimension_numbers = #tpu.dot_dimension_numbers<[1], [1], [0], [0], [0, 0, 1, 0], [], []>} : vector<8x32xbf16>, vector<8x32xbf16>, vector<8x8xf32> -> vector<8x8xf32>
    %74 = math.exp %73 : vector<8x8xf32>
    %cst_33 = arith.constant dense<0.000000e+00> : vector<8xf32>
    %75 = vector.multi_reduction <add>, %74, %cst_33 [1] : vector<8x8xf32> to vector<8xf32>
    %76 = vector.shape_cast %75 : vector<8xf32> to vector<8x1xf32>
    %77 = arith.mulf %74, %74 : vector<8x8xf32>
    %cst_34 = arith.constant dense<0.000000e+00> : vector<8xf32>
    %78 = vector.multi_reduction <add>, %77, %cst_34 [1] : vector<8x8xf32> to vector<8xf32>
    %79 = vector.shape_cast %78 : vector<8xf32> to vector<8x1xf32>
    %cst_35 = arith.constant dense<0.000000e+00> : vector<8x8xf32>
    %80 = tpu.matmul %23, %47, %cst_35 {dimension_numbers = #tpu.dot_dimension_numbers<[1], [1], [0], [0], [0, 0, 1, 0], [], []>} : vector<8x32xbf16>, vector<8x32xbf16>, vector<8x8xf32> -> vector<8x8xf32>
    %81 = math.exp %80 : vector<8x8xf32>
    %cst_36 = arith.constant dense<0.000000e+00> : vector<8xf32>
    %82 = vector.multi_reduction <add>, %81, %cst_36 [1] : vector<8x8xf32> to vector<8xf32>
    %83 = vector.shape_cast %82 : vector<8xf32> to vector<8x1xf32>
    %84 = arith.mulf %81, %81 : vector<8x8xf32>
    %cst_37 = arith.constant dense<0.000000e+00> : vector<8xf32>
    %85 = vector.multi_reduction <add>, %84, %cst_37 [1] : vector<8x8xf32> to vector<8xf32>
    %86 = vector.shape_cast %85 : vector<8xf32> to vector<8x1xf32>
    %87 = arith.addf %76, %83 : vector<8x1xf32>
    %88 = arith.addf %79, %86 : vector<8x1xf32>
    %c0_38 = arith.constant 0 : index
    %c1 = arith.constant 1 : index
    %89 = vector.load %arg7[%c0_38, %c1] : memref<8x8xf32, #tpu.memory_space<vmem>>, vector<8x1xf32>
    %90 = arith.addf %89, %87 : vector<8x1xf32>
    %c0_39 = arith.constant 0 : index
    %c1_40 = arith.constant 1 : index
    %91 = vector.load %arg7[%c0_39, %c1_40] : memref<8x8xf32, #tpu.memory_space<vmem>>, vector<8x1xf32>
    tpu.vector_store %arg7[%c0_39, %c1_40], %90 {strides = array<i32>} : memref<8x8xf32, #tpu.memory_space<vmem>>, vector<8x1xf32>,
    %c0_41 = arith.constant 0 : index
    %c3 = arith.constant 3 : index
    %92 = vector.load %arg7[%c0_41, %c3] : memref<8x8xf32, #tpu.memory_space<vmem>>, vector<8x1xf32>
    %93 = arith.addf %92, %88 : vector<8x1xf32>
    %c0_42 = arith.constant 0 : index
    %c3_43 = arith.constant 3 : index
    %94 = vector.load %arg7[%c0_42, %c3_43] : memref<8x8xf32, #tpu.memory_space<vmem>>, vector<8x1xf32>
    tpu.vector_store %arg7[%c0_42, %c3_43], %93 {strides = array<i32>} : memref<8x8xf32, #tpu.memory_space<vmem>>, vector<8x1xf32>,
    %c0_i32_44 = arith.constant 0 : i32
    %95 = arith.cmpi eq, %arg1, %c0_i32_44 : i32
    %96 = arith.extui %95 : i1 to i32
    %c0_i32_45 = arith.constant 0 : i32
    %97 = arith.cmpi ne, %96, %c0_i32_45 : i32
    scf.if %97 {
      %98 = arith.extf %11 : vector<8x32xbf16> to vector<8x32xf32>
      %99 = arith.extf %23 : vector<8x32xbf16> to vector<8x32xf32>
      %100 = arith.mulf %98, %99 : vector<8x32xf32>
      %cst_46 = arith.constant dense<0.000000e+00> : vector<8xf32>
      %101 = vector.multi_reduction <add>, %100, %cst_46 [1] : vector<8x32xf32> to vector<8xf32>
      %102 = vector.shape_cast %101 : vector<8xf32> to vector<8x1xf32>
      %103 = math.exp %102 : vector<8x1xf32>
      %104 = arith.mulf %98, %98 : vector<8x32xf32>
      %cst_47 = arith.constant dense<0.000000e+00> : vector<8xf32>
      %105 = vector.multi_reduction <add>, %104, %cst_47 [1] : vector<8x32xf32> to vector<8xf32>
      %106 = vector.shape_cast %105 : vector<8xf32> to vector<8x1xf32>
      %107 = math.exp %106 : vector<8x1xf32>
      %108 = arith.mulf %99, %99 : vector<8x32xf32>
      %cst_48 = arith.constant dense<0.000000e+00> : vector<8xf32>
      %109 = vector.multi_reduction <add>, %108, %cst_48 [1] : vector<8x32xf32> to vector<8xf32>
      %110 = vector.shape_cast %109 : vector<8xf32> to vector<8x1xf32>
      %111 = math.exp %110 : vector<8x1xf32>
      %c0_49 = arith.constant 0 : index
      %c0_50 = arith.constant 0 : index
      %112 = vector.load %arg7[%c0_49, %c0_50] : memref<8x8xf32, #tpu.memory_space<vmem>>, vector<8x1xf32>
      %c0_51 = arith.constant 0 : index
      %c2_52 = arith.constant 2 : index
      %113 = vector.load %arg7[%c0_51, %c2_52] : memref<8x8xf32, #tpu.memory_space<vmem>>, vector<8x1xf32>
      %114 = arith.mulf %107, %107 : vector<8x1xf32>
      %115 = arith.subf %113, %114 : vector<8x1xf32>
      %116 = arith.mulf %103, %103 : vector<8x1xf32>
      %117 = arith.subf %115, %116 : vector<8x1xf32>
      %cst_53 = arith.constant 0.000000e+00 : f32
      %118 = vector.broadcast %cst_53 : f32 to vector<8x1xf32>
      %119 = arith.subf %117, %118 : vector<8x1xf32>
      %120 = arith.subf %112, %107 : vector<8x1xf32>
      %121 = arith.subf %120, %103 : vector<8x1xf32>
      %cst_54 = arith.constant 0.000000e+00 : f32
      %122 = vector.broadcast %cst_54 : f32 to vector<8x1xf32>
      %123 = arith.subf %121, %122 : vector<8x1xf32>
      %cst_55 = arith.constant 1.400000e+01 : f32
      %124 = vector.broadcast %cst_55 : f32 to vector<8x1xf32>
      %125 = arith.mulf %119, %124 : vector<8x1xf32>
      %126 = tpu.reciprocal %123 {approx = true} : vector<8x1xf32> -> vector<8x1xf32>
      %127 = arith.mulf %125, %126 : vector<8x1xf32>
      %cst_56 = arith.constant -1.400000e+00 : f32
      %128 = vector.broadcast %cst_56 : f32 to vector<8x1xf32>
      %129 = arith.mulf %128, %103 : vector<8x1xf32>
      %130 = arith.addf %129, %127 : vector<8x1xf32>
      %cst_57 = arith.constant 0.899999976 : f32
      %131 = vector.broadcast %cst_57 : f32 to vector<8x1xf32>
      %132 = arith.divf %130, %131 : vector<8x1xf32>
      %cst_58 = arith.constant 1.89469397 : f32
      %133 = vector.broadcast %cst_58 : f32 to vector<8x1xf32>
      %134 = arith.maximumf %132, %133 : vector<8x1xf32>
      %135 = arith.addf %103, %134 : vector<8x1xf32>
      %136 = arith.divf %103, %135 : vector<8x1xf32>
      %137 = math.log %136 : vector<8x1xf32>
      %cst_59 = arith.constant 0.000000e+00 : f32
      %138 = vector.broadcast %cst_59 : f32 to vector<8x1xf32>
      %139 = arith.subf %138, %137 : vector<8x1xf32>
      %c0_60 = arith.constant 0 : index
      %c0_61 = arith.constant 0 : index
      %140 = vector.load %arg6[%c0_60, %c0_61] : memref<8x2xf32, #tpu.memory_space<vmem>>, vector<8x1xf32>
      tpu.vector_store %arg6[%c0_60, %c0_61], %139 {strides = array<i32>} : memref<8x2xf32, #tpu.memory_space<vmem>>, vector<8x1xf32>,
      %c0_62 = arith.constant 0 : index
      %c1_63 = arith.constant 1 : index
      %141 = vector.load %arg7[%c0_62, %c1_63] : memref<8x8xf32, #tpu.memory_space<vmem>>, vector<8x1xf32>
      %c0_64 = arith.constant 0 : index
      %c3_65 = arith.constant 3 : index
      %142 = vector.load %arg7[%c0_64, %c3_65] : memref<8x8xf32, #tpu.memory_space<vmem>>, vector<8x1xf32>
      %143 = arith.mulf %111, %111 : vector<8x1xf32>
      %144 = arith.subf %142, %143 : vector<8x1xf32>
      %145 = arith.mulf %103, %103 : vector<8x1xf32>
      %146 = arith.subf %144, %145 : vector<8x1xf32>
      %cst_66 = arith.constant 0.000000e+00 : f32
      %147 = vector.broadcast %cst_66 : f32 to vector<8x1xf32>
      %148 = arith.subf %146, %147 : vector<8x1xf32>
      %149 = arith.subf %141, %111 : vector<8x1xf32>
      %150 = arith.subf %149, %103 : vector<8x1xf32>
      %cst_67 = arith.constant 0.000000e+00 : f32
      %151 = vector.broadcast %cst_67 : f32 to vector<8x1xf32>
      %152 = arith.subf %150, %151 : vector<8x1xf32>
      %cst_68 = arith.constant 1.400000e+01 : f32
      %153 = vector.broadcast %cst_68 : f32 to vector<8x1xf32>
      %154 = arith.mulf %148, %153 : vector<8x1xf32>
      %155 = tpu.reciprocal %152 {approx = true} : vector<8x1xf32> -> vector<8x1xf32>
      %156 = arith.mulf %154, %155 : vector<8x1xf32>
      %cst_69 = arith.constant -1.400000e+00 : f32
      %157 = vector.broadcast %cst_69 : f32 to vector<8x1xf32>
      %158 = arith.mulf %157, %103 : vector<8x1xf32>
      %159 = arith.addf %158, %156 : vector<8x1xf32>
      %cst_70 = arith.constant 0.899999976 : f32
      %160 = vector.broadcast %cst_70 : f32 to vector<8x1xf32>
      %161 = arith.divf %159, %160 : vector<8x1xf32>
      %cst_71 = arith.constant 1.89469397 : f32
      %162 = vector.broadcast %cst_71 : f32 to vector<8x1xf32>
      %163 = arith.maximumf %161, %162 : vector<8x1xf32>
      %164 = arith.addf %103, %163 : vector<8x1xf32>
      %165 = arith.divf %103, %164 : vector<8x1xf32>
      %166 = math.log %165 : vector<8x1xf32>
      %cst_72 = arith.constant 0.000000e+00 : f32
      %167 = vector.broadcast %cst_72 : f32 to vector<8x1xf32>
      %168 = arith.subf %167, %166 : vector<8x1xf32>
      %c0_73 = arith.constant 0 : index
      %c1_74 = arith.constant 1 : index
      %169 = vector.load %arg6[%c0_73, %c1_74] : memref<8x2xf32, #tpu.memory_space<vmem>>, vector<8x1xf32>
      tpu.vector_store %arg6[%c0_73, %c1_74], %168 {strides = array<i32>} : memref<8x2xf32, #tpu.memory_space<vmem>>, vector<8x1xf32>,
    } else {
    }
    return
  }
  func.func @transform_0(%arg0: i32, %arg1: i32) -> (i32, i32) {
    %c0_i32 = arith.constant 0 : i32
    %c0_i32_0 = arith.constant 0 : i32
    return %arg0, %c0_i32 : i32, i32
  }
  func.func @transform_1(%arg0: i32, %arg1: i32) -> (i32, i32) {
    %c0_i32 = arith.constant 0 : i32
    %c0_i32_0 = arith.constant 0 : i32
    return %arg0, %c0_i32 : i32, i32
  }
  func.func @transform_2(%arg0: i32, %arg1: i32) -> (i32, i32) {
    %c0_i32 = arith.constant 0 : i32
    %c0_i32_0 = arith.constant 0 : i32
    return %arg1, %c0_i32 : i32, i32
  }
  func.func @transform_3(%arg0: i32, %arg1: i32) -> (i32, i32) {
    %c0_i32 = arith.constant 0 : i32
    %c0_i32_0 = arith.constant 0 : i32
    return %arg1, %c0_i32 : i32, i32
  }
  func.func @transform_4(%arg0: i32, %arg1: i32) -> (i32, i32) {
    %c0_i32 = arith.constant 0 : i32
    %c0_i32_0 = arith.constant 0 : i32
    return %arg0, %c0_i32 : i32, i32
  }
}

</mosaic_0001>

<bundles_post_ra>
// kernel: hard_negative_loss.1
= control target key start
LH: loop header
LB: loop body
LE: loop exit
PB: predicated region body
PF: predicated region fallthrough
CT: control target
= control target key end

     0   :  { %9 = vsyncpa [#allocation4], 0  ;;  %s673_s0 = inlined_call_operand.hbm [shape: f32[8,32], index: 0, kind: input, shape index: {}, may-alias: {0,2}]   ;;  %s674_s1 = inlined_call_operand.hbm [shape: f32[8,32], index: 1, kind: input, shape index: {}, may-alias: {1,3}]   ;;  %s675_s2 = inlined_call_operand.hbm [shape: f32[8,32], index: 2, kind: input, shape index: {}, may-alias: {0,2}]   ;;  %s676_s3 = inlined_call_operand.hbm [shape: f32[8,32], index: 3, kind: input, shape index: {}, may-alias: {1,3}]   ;;  %s677_s4 = inlined_call_operand.vmem [shape: f32[8,2], index: 4, kind: output, shape index: {}]  }
   0x1   :  { %10 = vsyncpa [#allocation6], 0 }
   0x2   :  { %11 = vsyncpa [#allocation9], 0  ;;  %s592_s15 = smov [#allocation5]   ;;  %s593_s17 = smov [#allocation3]  }
   0x3   :  { %s28_s16 = sshll.u32 %s592_s15, 4  ;;  %s18_s18 = sshll.u32 %s593_s17, 4  ;;  %s29_s16 = int_to_ptr.vmem [resolvable:$true] %s28_s16  ;;  %s19_s18 = int_to_ptr.vmem [resolvable:$true] %s18_s18 }
   0x4   :  { %s514_s19 = scalar_lea.vmem %s29_s16, 128  ;;  %p519_p1 = scmp.lt.s32.totalorder %s29_s16, %s29_s16 }
   0x5   :  { %p515_p0 = scmp.ne.s32.totalorder %s29_s16, %s514_s19  ;;  %p520_p2 = scmp.lt.s32.totalorder %s514_s19, %s514_s19 }
   0x7   :  { %p521_p3 = por %p520_p2, %p519_p1 }
   0x9   :  { %p522_p4 = pnand %p521_p3, %p515_p0 }
   0xb   :  { %525 = shalt.err (!%p522_p4)
}
   0xc   :  { %31 = dma.hbm_to_vmem [thread:$0]  %s674_s1, 128, %s29_s16, [#allocation6]  }
   0xd   :  { %s534_s22 = scalar_lea.vmem %s19_s18, 128  ;;  %p539_p6 = scmp.lt.s32.totalorder %s19_s18, %s19_s18 }
   0xe   :  { %p535_p5 = scmp.ne.s32.totalorder %s19_s18, %s534_s22  ;;  %p540_p7 = scmp.lt.s32.totalorder %s534_s22, %s534_s22 }
  0x10   :  { %p541_p8 = por %p540_p7, %p539_p6 }
  0x12   :  { %p542_p9 = pnand %p541_p8, %p535_p5 }
  0x14   :  { %545 = shalt.err (!%p542_p9)
}
  0x15   :  { %21 = dma.hbm_to_vmem [thread:$0]  %s673_s0, 128, %s19_s18, [#allocation4]  }
  0x16   :  { %s594_s25 = smov [#allocation7]   ;;  %s595_s27 = smov [#allocation8]  }
  0x17   :  { %s38_s26 = sshll.u32 %s594_s25, 4  ;;  %s48_s28 = sshll.u32 %s595_s27, 4  ;;  %s39_s26 = int_to_ptr.vmem [resolvable:$true] %s38_s26  ;;  %s49_s28 = int_to_ptr.vmem [resolvable:$true] %s48_s28 }
  0x18   :  { %s554_s29 = scalar_lea.vmem %s39_s26, 128  ;;  %p559_p11 = scmp.lt.s32.totalorder %s39_s26, %s39_s26 }
  0x19   :  { %p555_p10 = scmp.ne.s32.totalorder %s39_s26, %s554_s29  ;;  %p560_p12 = scmp.lt.s32.totalorder %s554_s29, %s554_s29 }
  0x1b   :  { %p561_p13 = por %p560_p12, %p559_p11 }
  0x1d   :  { %p562_p0 = pnand %p561_p13, %p555_p10 }
  0x1f   :  { %565 = shalt.err (!%p562_p0)
}
  0x20   :  { %41 = dma.hbm_to_vmem [thread:$0]  %s675_s2, 128, %s39_s26, [#allocation6]  }
  0x21   :  { %s574_s5 = scalar_lea.vmem %s49_s28, 128  ;;  %p579_p2 = scmp.lt.s32.totalorder %s49_s28, %s49_s28 }
  0x22   :  { %p575_p1 = scmp.ne.s32.totalorder %s49_s28, %s574_s5  ;;  %p580_p3 = scmp.lt.s32.totalorder %s574_s5, %s574_s5 }
  0x24   :  { %p581_p4 = por %p580_p3, %p579_p2 }
  0x26   :  { %p582_p5 = pnand %p581_p4, %p575_p1 }
  0x28   :  { %585 = shalt.err (!%p582_p5)
}
  0x29   :  { %51 = dma.hbm_to_vmem [thread:$0]  %s676_s3, 128, %s49_s28, [#allocation9]  }
  0x2a   :  { %586 = dma.done.wait [#allocation4], 128  }
  0x2b   :  { %587 = vsyncadd [#allocation4], 4294967168 }
  0x2c   :  { %588 = dma.done.wait [#allocation6], 256  }
  0x2d   :  { %589 = vsyncadd [#allocation6], 4294967040 }
  0x2e   :  { %590 = dma.done.wait [#allocation9], 128  }
  0x2f   :  { %591 = vsyncadd [#allocation9], 4294967168  ;;  %vm67_vm0 = vcmask 261120   ;;  %v86_v0 = vld [vmem:[#allocation7] sm:$0xff]  ;;  %v96_v1 = vld [vmem:[#allocation8] sm:$0xff]  ;;  %v596_v12 = vmov 0.0  }
  0x30   :  { %v65_v2 = vld [vmem:[#allocation3] sm:$0xff]  ;;  %v87_v3 = vmul.f32 %v86_v0, %v86_v0  ;;  %v97_v4 = vmul.f32 %v96_v1, %v96_v1  ;;  %v76_v6 = vld [vmem:[#allocation5] sm:$0xff]  ;;  %440 = vmatprep.subr.bf16.mxu0 %v596_v12  ;;  %446 = vmatprep.subr.bf16.mxu1 %v596_v12  ;;  %vm597_vm1 = vmmov 0   ;;  %vm110_vm2 = vcmask 64512   ;;  %s598_s2 = smov 2   ;;  %s599_s3 = smov 126  }
  0x31   :  { %v66_v5 = vmul.f32 %v65_v2, %v65_v2  ;;  %v77_v7 = vmul.f32 %v76_v6, %v76_v6  ;;  %442 = vmatprep.mubr.msk.bf16.mxu0 %vm597_vm1, %v596_v12  ;;  %448 = vmatprep.mubr.msk.bf16.mxu1 %vm597_vm1, %v596_v12  ;;  %111 = vst.msk [vmem:[#allocation2] sm:$0xff] %vm110_vm2, %v596_v12  ;;  %vm224_vm3 = vcmask 7168   ;;  %vm228_vm4 = vcmask 23568  }
  0x32   :  { %v88_v8 = vsel %vm67_vm0, %v87_v3, 0.0  ;;  %v98_v10 = vsel %vm67_vm0, %v97_v4, 0.0  ;;  %vm335_vm5 = vcmask 15368   ;;  %vm339_vm6 = vcmask 31768  }
  0x33   :  { %v68_v9 = vsel %vm67_vm0, %v66_v5, 0.0  ;;  %89 = vadd.xlane.f32.xlu0 %v88_v8  ;;  %v78_v11 = vsel %vm67_vm0, %v77_v7, 0.0 }
  0x34   :  { %69 = vadd.xlane.f32.xlu1 %v68_v9 }
  0x37   :  { %99 = vadd.xlane.f32.xlu0 %v98_v10 }
  0x38   :  { %79 = vadd.xlane.f32.xlu1 %v78_v11 }
  0xbc   :  { %v90_v13 = vpop.xlane.xlu0 %89 }
  0xbd   :  { %v70_v14 = vpop.xlane.xlu1 %69  ;;  %v91_v15 = vmax.f32 %v90_v13, 1e-24 }
  0xbe   :  { %v71_v16 = vmax.f32 %v70_v14, 1e-24 }
  0xbf   :  { %472 = vrsqrt.f32 %v91_v15 }
  0xc0   :  { %v100_v17 = vpop.xlane.xlu0 %99  ;;  %474 = vrsqrt.f32 %v71_v16 }
  0xc1   :  { %v80_v18 = vpop.xlane.xlu1 %79  ;;  %v101_v19 = vmax.f32 %v100_v17, 1e-24 }
  0xc2   :  { %v81_v20 = vmax.f32 %v80_v18, 1e-24 }
  0xc3   :  { %476 = vrsqrt.f32 %v101_v19 }
  0xc4   :  { %478 = vrsqrt.f32 %v81_v20  ;;  %v222_v20 = vld [vmem:[#allocation2] sm:$0xff] }
  0xcc   :  { %v473_v21 = vpop.eup %472 }
  0xcd   :  { %v475_v22 = vpop.eup %474  ;;  %v93_v23 = vmul.f32 1.4142135, %v473_v21 }
  0xce   :  { %v73_v24 = vmul.f32 1.4142135, %v475_v22 }
  0xcf   :  { %v94_v25 = vmul.f32 %v93_v23, %v86_v0 }
  0xd0   :  { %v477_v26 = vpop.eup %476  ;;  %v74_v27 = vmul.f32 %v73_v24, %v65_v2 }
  0xd1   :  { %v479_v28 = vpop.eup %478  ;;  %v103_v29 = vmul.f32 1.4142135, %v477_v26  ;;  %v95_v30 = vpack.c.bf16 %v94_v25, %v94_v25 }
  0xd2   :  { %v83_v31 = vmul.f32 1.4142135, %v479_v28  ;;  %v75_v34 = vpack.c.bf16 %v74_v27, %v74_v27 }
  0xd3   :  { %v116_v32 = vsel %vm67_vm0, %v95_v30, 0  ;;  %v104_v33 = vmul.f32 %v103_v29, %v96_v1 }
  0xd4   :  { %v84_v35 = vmul.f32 %v83_v31, %v76_v6  ;;  %441 = vmatpush3.bf16.xpose.msra.mxu0 %v116_v32  ;;  %v344_v38 = vunpack.c.l.bf16 %v75_v34 }
  0xd5   :  { %v105_v36 = vpack.c.bf16 %v104_v33, %v104_v33  ;;  %452 = vmatprep.subr.bf16.mxu0 %v596_v12 }
  0xd6   :  { %v85_v37 = vpack.c.bf16 %v84_v35, %v84_v35  ;;  %v352_v8 = vmul.f32 %v344_v38, %v344_v38 }
  0xd7   :  { %v169_v39 = vsel %vm67_vm0, %v105_v36, 0 }
  0xd8   :  { %447 = vmatpush3.bf16.xpose.msra.mxu1 %v169_v39  ;;  %v345_v40 = vunpack.c.l.bf16 %v85_v37  ;;  %v353_v11 = vsel %vm67_vm0, %v352_v8, 0.0 }
  0xd9   :  { %458 = vmatprep.subr.bf16.mxu1 %v596_v12 }
  0xda   :  { %v346_v41 = vmul.f32 %v345_v40, %v344_v38 }
  0xdb   :  { %443 = vmatmul.mubr.msk.bf16.vlgmr.msra.gmra.mxu0 %vm67_vm0, %v75_v34 }
  0xdc   :  { %453 = vmatpush3.bf16.xpose.msra.mxu0 %v116_v32  ;;  %454 = vmatprep.mubr.msk.bf16.mxu0 %vm597_vm1, %v596_v12  ;;  %v347_v16 = vsel %vm67_vm0, %v346_v41, 0.0 }
  0xdf   :  { %449 = vmatmul.mubr.msk.bf16.vlgmr.msra.gmra.mxu1 %vm67_vm0, %v75_v34 }
  0xe0   :  { %459 = vmatpush3.bf16.xpose.msra.mxu1 %v169_v39  ;;  %460 = vmatprep.mubr.msk.bf16.mxu1 %vm597_vm1, %v596_v12  ;;  %v358_v12 = vmul.f32 %v345_v40, %v345_v40 }
  0xe2   :  { %v359_v15 = vsel %vm67_vm0, %v358_v12, 0.0 }
  0xe3   :  { %455 = vmatmul.mubr.msk.bf16.vlgmr.msra.gmra.mxu0 %vm67_vm0, %v85_v37 }
  0xe7   :  { %461 = vmatmul.mubr.msk.bf16.vlgmr.msra.gmra.mxu1 %vm67_vm0, %v85_v37 }
 0x19b   :  { %v152_v42 = vpop.f32.mrf.mxu0 }
 0x19c   :  { %v158_v43 = vmul.f32 1.442695, %v152_v42 }
 0x19d   :  { %v444_v44 = vpop.f32.mrf.mxu0 }
 0x19e   :  { %480 = vpow2.f32 %v158_v43 }
 0x19f   :  { %v155_v45 = vpop.f32.mrf.mxu0  ;;  %v205_v46 = vpop.f32.mrf.mxu1 }
 0x1a0   :  { %v211_v47 = vmul.f32 1.442695, %v205_v46 }
 0x1a1   :  { %v445_v48 = vpop.f32.mrf.mxu0  ;;  %v450_v49 = vpop.f32.mrf.mxu1 }
 0x1a2   :  { %482 = vpow2.f32 %v211_v47 }
 0x1a3   :  { %v208_v50 = vpop.f32.mrf.mxu1  ;;  %v267_v51 = vpop.f32.mrf.mxu0 }
 0x1a4   :  { %v273_v52 = vmul.f32 1.442695, %v267_v51 }
 0x1a5   :  { %v451_v53 = vpop.f32.mrf.mxu1  ;;  %v456_v54 = vpop.f32.mrf.mxu0 }
 0x1a6   :  { %484 = vpow2.f32 %v273_v52 }
 0x1a7   :  { %v316_v55 = vpop.f32.mrf.mxu1  ;;  %v270_v56 = vpop.f32.mrf.mxu0 }
 0x1a8   :  { %v322_v57 = vmul.f32 1.442695, %v316_v55 }
 0x1a9   :  { %v462_v58 = vpop.f32.mrf.mxu1  ;;  %v457_v59 = vpop.f32.mrf.mxu0 }
 0x1aa   :  { %486 = vpow2.f32 %v322_v57 }
 0x1ab   :  { %v481_v60 = vpop.eup %480  ;;  %v319_v61 = vpop.f32.mrf.mxu1 }
 0x1ac   :  { %v161_v62 = vsel %vm110_vm2, %v481_v60, 0.0  ;;  %v164_v63 = vmul.f32 %v481_v60, %v481_v60 }
 0x1ad   :  { %162 = vadd.xlane.f32.xlu0 %v161_v62  ;;  %v463_v0 = vpop.f32.mrf.mxu1 }
 0x1ae   :  { %v165_v1 = vsel %vm110_vm2, %v164_v63, 0.0 }
 0x1af   :  { %v483_v2 = vpop.eup %482 }
 0x1b0   :  { %v213_v3 = vsel %vm110_vm2, %v483_v2, 0.0  ;;  %v216_v4 = vmul.f32 %v483_v2, %v483_v2 }
 0x1b1   :  { %214 = vadd.xlane.f32.xlu1 %v213_v3  ;;  %166 = vadd.xlane.f32.xlu0 %v165_v1 }
 0x1b2   :  { %v217_v6 = vsel %vm110_vm2, %v216_v4, 0.0 }
 0x1b3   :  { %v485_v5 = vpop.eup %484 }
 0x1b4   :  { %v275_v7 = vsel %vm110_vm2, %v485_v5, 0.0  ;;  %v278_v13 = vmul.f32 %v485_v5, %v485_v5 }
 0x1b5   :  { %218 = vadd.xlane.f32.xlu1 %v217_v6  ;;  %276 = vadd.xlane.f32.xlu0 %v275_v7 }
 0x1b6   :  { %v279_v17 = vsel %vm110_vm2, %v278_v13, 0.0 }
 0x1b7   :  { %v487_v9 = vpop.eup %486 }
 0x1b8   :  { %v324_v10 = vsel %vm110_vm2, %v487_v9, 0.0  ;;  %v327_v14 = vmul.f32 %v487_v9, %v487_v9 }
 0x1b9   :  { %325 = vadd.xlane.f32.xlu1 %v324_v10  ;;  %354 = vadd.xlane.f32.xlu0 %v353_v11 }
 0x1ba   :  { %v328_v18 = vsel %vm110_vm2, %v327_v14, 0.0 }
 0x1bd   :  { %360 = vadd.xlane.f32.xlu1 %v359_v15  ;;  %348 = vadd.xlane.f32.xlu0 %v347_v16 }
 0x1c1   :  { %280 = vadd.xlane.f32.xlu1 %v279_v17  ;;  %329 = vadd.xlane.f32.xlu0 %v328_v18 }
 0x236   :  { %v163_v19 = vpop.xlane.xlu0 %162 }
 0x23a   :  { %v215_v21 = vpop.xlane.xlu1 %214  ;;  %v167_v24 = vpop.xlane.xlu0 %166 }
 0x23b   :  { %v220_v22 = vadd.f32 %v215_v21, %v163_v19 }
 0x23d   :  { %v223_v23 = vadd.f32 %v222_v20, %v220_v22 }
 0x23e   :  { %v219_v25 = vpop.xlane.xlu1 %218  ;;  %v277_v26 = vpop.xlane.xlu0 %276 }
 0x23f   :  { %225 = vst.msk [vmem:[#allocation2] sm:$0xff] %vm224_vm3, %v223_v23  ;;  %v221_v27 = vadd.f32 %v219_v25, %v167_v24 }
 0x242   :  { %v326_v29 = vpop.xlane.xlu1 %325  ;;  %v355_v31 = vpop.xlane.xlu0 %354 }
 0x243   :  { %v356_v33 = vmul.f32 1.442695, %v355_v31  ;;  %v331_v34 = vadd.f32 %v326_v29, %v277_v26 }
 0x245   :  { %488 = vpow2.f32 %v356_v33 }
 0x246   :  { %v226_v28 = vld [vmem:[#allocation2] sm:$0xff]  ;;  %v361_v32 = vpop.xlane.xlu1 %360  ;;  %v349_v38 = vpop.xlane.xlu0 %348 }
 0x247   :  { %v227_v30 = vadd.f32 %v226_v28, %v221_v27  ;;  %v362_v35 = vmul.f32 1.442695, %v361_v32  ;;  %v350_v39 = vmul.f32 1.442695, %v349_v38 }
 0x249   :  { %229 = vst.msk [vmem:[#allocation2] sm:$0xff] %vm228_vm4, %v227_v30  ;;  %490 = vpow2.f32 %v362_v35 }
 0x24a   :  { %v330_v40 = vpop.xlane.xlu0 %329  ;;  %v281_v41 = vpop.xlane.xlu1 %280  ;;  %492 = vpow2.f32 %v350_v39 }
 0x24b   :  { %v332_v42 = vadd.f32 %v330_v40, %v281_v41 }
 0x250   :  { %v333_v36 = vld [vmem:[#allocation2] sm:$0xff] }
 0x251   :  { %v334_v37 = vadd.f32 %v333_v36, %v331_v34 }
 0x252   :  { %v489_v45 = vpop.eup %488 }
 0x253   :  { %336 = vst.msk [vmem:[#allocation2] sm:$0xff] %vm335_vm5, %v334_v37  ;;  %v365_v48 = vmul.f32 %v489_v45, %v489_v45 }
 0x256   :  { %v491_v46 = vpop.eup %490 }
 0x257   :  { %v395_v47 = vmul.f32 %v491_v46, %v491_v46  ;;  %v493_v54 = vpop.eup %492 }
 0x258   :  { %v367_v59 = vmul.f32 %v493_v54, %v493_v54  ;;  %v378_v1 = vmul.f32 -1.4, %v493_v54 }
 0x25a   :  { %v337_v43 = vld [vmem:[#allocation2] sm:$0xff] }
 0x25b   :  { %v338_v44 = vadd.f32 %v337_v43, %v332_v42 }
 0x25d   :  { %340 = vst.msk [vmem:[#allocation2] sm:$0xff] %vm339_vm6, %v338_v44 }
 0x264   :  { %v394_v49 = vld [vmem:[#allocation2] sm:$0xff] }
 0x265   :  { %v398_v50 = vsub.f32 %v394_v49, %v491_v46  ;;  %v369_v51 = vsub.f32 %v394_v49, %v489_v45  ;;  %v396_v52 = vsub.f32 %v394_v49, %v395_v47  ;;  %v366_v53 = vsub.f32 %v394_v49, %v365_v48 }
 0x267   :  { %v399_v55 = vsub.f32 %v398_v50, %v493_v54  ;;  %v370_v56 = vsub.f32 %v369_v51, %v493_v54  ;;  %v397_v60 = vsub.f32 %v396_v52, %v367_v59  ;;  %v368_v61 = vsub.f32 %v366_v53, %v367_v59 }
 0x269   :  { %494 = vrcp.f32 %v399_v55  ;;  %v400_v62 = vmul.f32 14.0, %v397_v60  ;;  %v371_v0 = vmul.f32 14.0, %v368_v61 }
 0x26a   :  { %496 = vrcp.f32 %v370_v56 }
 0x276   :  { %v495_v57 = vpop.eup %494 }
 0x277   :  { %v497_v58 = vpop.eup %496  ;;  %403 = vrot.lane.b32.xlu0 %v495_v57, %s598_s2 }
 0x278   :  { %374 = vrot.lane.b32.xlu1 %v497_v58, %s598_s2 }
 0x2e9   :  { %v404_v63 = vpop.permute.xlu0 %403 }
 0x2ea   :  { %v406_v2 = vmul.f32 %v404_v63, %v400_v62  ;;  %v375_v3 = vpop.permute.xlu1 %374 }
 0x2eb   :  { %v377_v4 = vmul.f32 %v375_v3, %v371_v0 }
 0x2ec   :  { %v407_v5 = vadd.f32 %v406_v2, %v378_v1 }
 0x2ed   :  { %v379_v6 = vadd.f32 %v378_v1, %v377_v4 }
 0x2ee   :  { %v408_v7 = vmul.f32 1.1111112, %v407_v5 }
 0x2ef   :  { %v381_v8 = vmul.f32 1.1111112, %v379_v6 }
 0x2f0   :  { %v409_v9 = vmax.f32 %v408_v7, 1.894694 }
 0x2f1   :  { %v382_v10 = vmax.f32 %v381_v8, 1.894694 }
 0x2f2   :  { %v410_v11 = vadd.f32 %v493_v54, %v409_v9 }
 0x2f3   :  { %v383_v12 = vadd.f32 %v493_v54, %v382_v10 }
 0x2f4   :  { %498 = vrcp.f32 %v410_v11 }
 0x2f5   :  { %500 = vrcp.f32 %v383_v12 }
 0x301   :  { %v499_v13 = vpop.eup %498 }
 0x302   :  { %v501_v14 = vpop.eup %500  ;;  %v412_v15 = vmul.f32 %v499_v13, %v493_v54 }
 0x303   :  { %v385_v16 = vmul.f32 %v501_v14, %v493_v54 }
 0x304   :  { %502 = vlog2.f32 %v412_v15 }
 0x305   :  { %504 = vlog2.f32 %v385_v16 }
 0x311   :  { %v503_v17 = vpop.eup %502 }
 0x312   :  { %v505_v18 = vpop.eup %504  ;;  %v414_v21 = vmul.f32 0.6931472, %v503_v17 }
 0x313   :  { %v387_v19 = vmul.f32 0.6931472, %v505_v18 }
 0x314   :  { %v415_v22 = vsub.f32 0.0, %v414_v21 }
 0x315   :  { %v388_v20 = vsub.f32 0.0, %v387_v19 }
 0x317   :  { %390 = vrot.lane.b32.xlu1 %v388_v20, %s599_s3 }
 0x31b   :  { %417 = vrot.lane.b32.xlu1 %v415_v22, %s599_s3 }
 0x389   :  { %v391_v23 = vpop.permute.xlu1 %390 }
 0x38a   :  { %393 = vst.msk [vmem:[%s677_s4] sm:$0xff] %vm224_vm3, %v391_v23 }
 0x38d   :  { %v418_v24 = vpop.permute.xlu1 %417 }
 0x38e   :  { %420 = vst.msk [vmem:[%s677_s4] sm:$0xff] %vm335_vm5, %v418_v24 }
 0x38f   :  { %425 = vsyncpa [#allocation4], 1 }
 0x390   :  { %426 = vsyncpa [#allocation6], 1 }
 0x391   :  { %427 = vsyncpa [#allocation9], 1 }

</bundles_post_ra>
